<compile_context>
chip_gen: v7x
topology: tpu7x:2x2x1
jax: 0.10.0
libtpu: 0.0.40
codegen_flags: <defaults>
</compile_context>

<pallas_src>
import jax
import jax.numpy as jnp
from jax.experimental import pallas as pl
from jax.experimental.pallas import tpu as pltpu


def merge_kernel(ne_ref, s1_ref, s2_ref, we_ref, w1_ref, w2_ref, b_ref, out_ref):
    # ne_ref: [TB, E] bf16, s1_ref/s2_ref: [TB, H] bf16
    # we_ref: [E, 2H] bf16, w1_ref/w2_ref: [H, 2H] bf16 (Wm|Wg fused, split by input chunk)
    # b_ref:  [1, 2H] f32 (bm|bg fused)
    # z == concat([ne, s1, s2], 1) @ (Wm|Wg) + (bm|bg), computed without materializing
    # the concat: three MXU matmuls with f32 accumulation, summed in f32.
    z = (jnp.dot(ne_ref[...], we_ref[...], preferred_element_type=jnp.float32)
         + jnp.dot(s1_ref[...], w1_ref[...], preferred_element_type=jnp.float32)
         + jnp.dot(s2_ref[...], w2_ref[...], preferred_element_type=jnp.float32)
         + b_ref[...])
    H = out_ref.shape[-1]
    h = jnp.tanh(z[:, :H])          # merge branch   (f32 elementwise, v5e-safe)
    g = jax.nn.sigmoid(z[:, H:])    # gate branch
    out_ref[...] = (h * g).astype(out_ref.dtype)


def prepare_merge_params(wm, bm, wg, bg, embedding_size):
    """One-time parameter preparation (hoisted out of the per-call path).

    wm, wg: [D, H] with D = 2H + E (PyTorch nn.Linear weight transposed to (in, out))
    bm, bg: [1, H]
    Returns (we, w1, w2, b): the fused Wm|Wg weight split along the input dim into the
    node-embedding / sub_tree_1 / sub_tree_2 chunks (bf16) plus the fused bias (f32).
    """
    H = wm.shape[1]
    E = embedding_size
    w = jnp.concatenate([wm, wg], axis=1)                          # [D, 2H]
    we = w[:E].astype(jnp.bfloat16)                                # [E, 2H]
    w1 = w[E:E + H].astype(jnp.bfloat16)                           # [H, 2H]
    w2 = w[E + H:].astype(jnp.bfloat16)                            # [H, 2H]
    b = jnp.concatenate([bm, bg], axis=1).astype(jnp.float32)      # [1, 2H]
    return we, w1, w2, b


def _pick_tile_b(B, max_tile=512):
    """Batch tile: as large as possible (cap 512), but >= 2 balanced tiles when there
    are enough rows so v7x's two TensorCores both get work; single step for tiny B."""
    Bp = 8 * ((B + 7) // 8)
    if Bp <= 8:
        return Bp
    if Bp <= max_tile:
        return 8 * (((Bp + 1) // 2 + 7) // 8)   # ~half the rows per tile, sublane-aligned
    return max_tile


def merge_forward(node_embedding, sub_tree_1, sub_tree_2, params, *, max_tile_b=512):
    """Batched Merge cell.

    node_embedding: [B, E], sub_tree_1/2: [B, H]; params from prepare_merge_params.
    Returns [B, H] = tanh(x@Wm+bm) * sigmoid(x@Wg+bg) with x = concat([node, st1, st2], 1).
    B == 1 reproduces the original module's single-node forward.
    """
    we, w1, w2, b = params
    B, E = node_embedding.shape
    H = sub_tree_1.shape[1]

    tile_b = _pick_tile_b(B, max_tile_b)
    Bp = tile_b * ((B + tile_b - 1) // tile_b)

    def pad_cast(x):
        x = x.astype(jnp.bfloat16)            # halve HBM input traffic (mem-bound kernel)
        if Bp != B:
            x = jnp.pad(x, ((0, Bp - B), (0, 0)))
        return x

    ne = pad_cast(node_embedding)
    s1 = pad_cast(sub_tree_1)
    s2 = pad_cast(sub_tree_2)

    out = pl.pallas_call(
        merge_kernel,
        out_shape=jax.ShapeDtypeStruct((Bp, H), jnp.float32),
        grid_spec=pltpu.PrefetchScalarGridSpec(
            num_scalar_prefetch=0,
            grid=(Bp // tile_b,),
            in_specs=[
                pl.BlockSpec((tile_b, E), lambda i: (i, 0)),   # node embeddings walk the batch
                pl.BlockSpec((tile_b, H), lambda i: (i, 0)),   # sub_tree_1
                pl.BlockSpec((tile_b, H), lambda i: (i, 0)),   # sub_tree_2
                pl.BlockSpec((E, 2 * H), lambda i: (0, 0)),    # fused weight chunks stay resident
                pl.BlockSpec((H, 2 * H), lambda i: (0, 0)),
                pl.BlockSpec((H, 2 * H), lambda i: (0, 0)),
                pl.BlockSpec((1, 2 * H), lambda i: (0, 0)),    # fused bias stays resident
            ],
            out_specs=pl.BlockSpec((tile_b, H), lambda i: (i, 0)),
        ),
        compiler_params=pltpu.CompilerParams(
            # Batch tiles are independent; lets v7x shard them across both TensorCores
            # (measured no-op on single-TC v5e/v6e, so harmless there).
            dimension_semantics=("parallel",),
        ),
    )(ne, s1, s2, we, w1, w2, b)
    return out[:B]


if __name__ == "__main__":
    # Sizes consistent with the module: decoder_embedding_size=E, decoder_hidden_size=H
    E = 32                 # cfg.decoder_embedding_size
    H = 32                 # cfg.decoder_hidden_size
    D = 2 * H + E          # linear input dim (= 96)
    B = 16                 # number of same-depth tree nodes merged per batched call

    key = jax.random.PRNGKey(0)
    k_node, k_s1, k_s2, k_wm, k_bm, k_wg, k_bg = jax.random.split(key, 7)

    node_embedding = jax.random.normal(k_node, (B, E), dtype=jnp.float32)
    sub_tree_1 = jax.random.normal(k_s1, (B, H), dtype=jnp.float32)
    sub_tree_2 = jax.random.normal(k_s2, (B, H), dtype=jnp.float32)

    # Deterministic parameter init mimicking nn.Linear: U(-1/sqrt(fan_in), 1/sqrt(fan_in))
    bound = 1.0 / (D ** 0.5)
    wm = jax.random.uniform(k_wm, (D, H), jnp.float32, -bound, bound)
    bm = jax.random.uniform(k_bm, (1, H), jnp.float32, -bound, bound)
    wg = jax.random.uniform(k_wg, (D, H), jnp.float32, -bound, bound)
    bg = jax.random.uniform(k_bg, (1, H), jnp.float32, -bound, bound)

    # One-time parameter prep (hoisted out of the forward path).
    params = prepare_merge_params(wm, bm, wg, bg, E)

    # Pure-JAX f32 reference: per-row identical to the PyTorch module's forward (eval mode).
    def ref_fn(ne, s1, s2):
        x = jnp.concatenate([ne, s1, s2], axis=1)
        return jnp.tanh(x @ wm + bm) * jax.nn.sigmoid(x @ wg + bg)

    # Batched path (many merge-cell evaluations in one kernel call).
    out_batched = merge_forward(node_embedding, sub_tree_1, sub_tree_2, params)
    jax.block_until_ready(out_batched)
    ref_batched = ref_fn(node_embedding, sub_tree_1, sub_tree_2)
    assert out_batched.shape == (B, H)
    # bf16 activations/weights with f32 accumulation: tolerance at the ~1e-3 level.
    assert jnp.allclose(out_batched, ref_batched, atol=2e-2), "batched mismatch vs reference"

    # Original-module signature (single node, [1, *] inputs) via the same kernel.
    out_single = merge_forward(node_embedding[:1], sub_tree_1[:1], sub_tree_2[:1], params)
    jax.block_until_ready(out_single)
    ref_single = ref_fn(node_embedding[:1], sub_tree_1[:1], sub_tree_2[:1])
    assert out_single.shape == (1, H)
    assert jnp.allclose(out_single, ref_single, atol=2e-2), "single-node mismatch vs reference"

    print("KERNEL_OK")
</pallas_src>

<mosaic_0001>
module attributes {stable_mosaic.version = 11 : i64} {
  func.func @merge_kernel(%arg0: i32, %arg1: memref<8x32xbf16, #tpu.memory_space<vmem>>, %arg2: memref<8x32xbf16, #tpu.memory_space<vmem>>, %arg3: memref<8x32xbf16, #tpu.memory_space<vmem>>, %arg4: memref<32x64xbf16, #tpu.memory_space<vmem>>, %arg5: memref<32x64xbf16, #tpu.memory_space<vmem>>, %arg6: memref<32x64xbf16, #tpu.memory_space<vmem>>, %arg7: memref<1x64xf32, #tpu.memory_space<vmem>>, %arg8: memref<8x32xf32, #tpu.memory_space<vmem>>) attributes {dimension_semantics = [#tpu.dimension_semantics<parallel>], iteration_bounds = array<i64: 2>, scalar_prefetch = 0 : i64, scratch_operands = 0 : i64, tpu.core_type = #tpu.core_type<tc>, window_params = [{transform_indices = @transform_0, window_bounds = array<i64: 8, 32>}, {transform_indices = @transform_1, window_bounds = array<i64: 8, 32>}, {transform_indices = @transform_2, window_bounds = array<i64: 8, 32>}, {pipeline_mode = #tpu.pipeline_mode<synchronous>, transform_indices = @transform_3, window_bounds = array<i64: 32, 64>}, {pipeline_mode = #tpu.pipeline_mode<synchronous>, transform_indices = @transform_4, window_bounds = array<i64: 32, 64>}, {pipeline_mode = #tpu.pipeline_mode<synchronous>, transform_indices = @transform_5, window_bounds = array<i64: 32, 64>}, {pipeline_mode = #tpu.pipeline_mode<synchronous>, transform_indices = @transform_6, window_bounds = array<i64: 1, 64>}, {transform_indices = @transform_7, window_bounds = array<i64: 8, 32>}]} {
    %c0 = arith.constant 0 : index
    %c0_0 = arith.constant 0 : index
    %0 = vector.load %arg1[%c0, %c0_0] : memref<8x32xbf16, #tpu.memory_space<vmem>>, vector<8x32xbf16>
    %c0_1 = arith.constant 0 : index
    %c0_2 = arith.constant 0 : index
    %1 = vector.load %arg4[%c0_1, %c0_2] : memref<32x64xbf16, #tpu.memory_space<vmem>>, vector<32x64xbf16>
    %cst = arith.constant dense<0.000000e+00> : vector<8x64xf32>
    %2 = tpu.matmul %0, %1, %cst {dimension_numbers = #tpu.dot_dimension_numbers<[1], [0], [0], [1], [0, 0, 1, 1], [], []>} : vector<8x32xbf16>, vector<32x64xbf16>, vector<8x64xf32> -> vector<8x64xf32>
    %c0_3 = arith.constant 0 : index
    %c0_4 = arith.constant 0 : index
    %3 = vector.load %arg2[%c0_3, %c0_4] : memref<8x32xbf16, #tpu.memory_space<vmem>>, vector<8x32xbf16>
    %c0_5 = arith.constant 0 : index
    %c0_6 = arith.constant 0 : index
    %4 = vector.load %arg5[%c0_5, %c0_6] : memref<32x64xbf16, #tpu.memory_space<vmem>>, vector<32x64xbf16>
    %cst_7 = arith.constant dense<0.000000e+00> : vector<8x64xf32>
    %5 = tpu.matmul %3, %4, %cst_7 {dimension_numbers = #tpu.dot_dimension_numbers<[1], [0], [0], [1], [0, 0, 1, 1], [], []>} : vector<8x32xbf16>, vector<32x64xbf16>, vector<8x64xf32> -> vector<8x64xf32>
    %6 = arith.addf %2, %5 : vector<8x64xf32>
    %c0_8 = arith.constant 0 : index
    %c0_9 = arith.constant 0 : index
    %7 = vector.load %arg3[%c0_8, %c0_9] : memref<8x32xbf16, #tpu.memory_space<vmem>>, vector<8x32xbf16>
    %c0_10 = arith.constant 0 : index
    %c0_11 = arith.constant 0 : index
    %8 = vector.load %arg6[%c0_10, %c0_11] : memref<32x64xbf16, #tpu.memory_space<vmem>>, vector<32x64xbf16>
    %cst_12 = arith.constant dense<0.000000e+00> : vector<8x64xf32>
    %9 = tpu.matmul %7, %8, %cst_12 {dimension_numbers = #tpu.dot_dimension_numbers<[1], [0], [0], [1], [0, 0, 1, 1], [], []>} : vector<8x32xbf16>, vector<32x64xbf16>, vector<8x64xf32> -> vector<8x64xf32>
    %10 = arith.addf %6, %9 : vector<8x64xf32>
    %c0_13 = arith.constant 0 : index
    %c0_14 = arith.constant 0 : index
    %11 = vector.load %arg7[%c0_13, %c0_14] : memref<1x64xf32, #tpu.memory_space<vmem>>, vector<1x64xf32>
    %12 = vector.broadcast %11 : vector<1x64xf32> to vector<8x64xf32>
    %13 = arith.addf %10, %12 : vector<8x64xf32>
    %14 = vector.extract_strided_slice %13 {offsets = [0, 0], sizes = [8, 32], strides = [1, 1]} : vector<8x64xf32> to vector<8x32xf32>
    %15 = math.tanh %14 : vector<8x32xf32>
    %16 = vector.extract_strided_slice %13 {offsets = [0, 32], sizes = [8, 32], strides = [1, 1]} : vector<8x64xf32> to vector<8x32xf32>
    %17 = arith.negf %16 : vector<8x32xf32>
    %18 = math.exp %17 : vector<8x32xf32>
    %cst_15 = arith.constant 1.000000e+00 : f32
    %19 = vector.broadcast %cst_15 : f32 to vector<8x32xf32>
    %20 = arith.addf %19, %18 : vector<8x32xf32>
    %21 = arith.divf %19, %20 : vector<8x32xf32>
    %22 = arith.mulf %15, %21 : vector<8x32xf32>
    %c0_16 = arith.constant 0 : index
    %c0_17 = arith.constant 0 : index
    %23 = vector.load %arg8[%c0_16, %c0_17] : memref<8x32xf32, #tpu.memory_space<vmem>>, vector<8x32xf32>
    tpu.vector_store %arg8[%c0_16, %c0_17], %22 {strides = array<i32>} : memref<8x32xf32, #tpu.memory_space<vmem>>, vector<8x32xf32>,
    return
  }
  func.func @transform_0(%arg0: i32) -> (i32, i32) {
    %c0_i32 = arith.constant 0 : i32
    %c0_i32_0 = arith.constant 0 : i32
    return %arg0, %c0_i32 : i32, i32
  }
  func.func @transform_1(%arg0: i32) -> (i32, i32) {
    %c0_i32 = arith.constant 0 : i32
    %c0_i32_0 = arith.constant 0 : i32
    return %arg0, %c0_i32 : i32, i32
  }
  func.func @transform_2(%arg0: i32) -> (i32, i32) {
    %c0_i32 = arith.constant 0 : i32
    %c0_i32_0 = arith.constant 0 : i32
    return %arg0, %c0_i32 : i32, i32
  }
  func.func @transform_3(%arg0: i32) -> (i32, i32) {
    %c0_i32 = arith.constant 0 : i32
    %c0_i32_0 = arith.constant 0 : i32
    %c0_i32_1 = arith.constant 0 : i32
    return %c0_i32, %c0_i32_0 : i32, i32
  }
  func.func @transform_4(%arg0: i32) -> (i32, i32) {
    %c0_i32 = arith.constant 0 : i32
    %c0_i32_0 = arith.constant 0 : i32
    %c0_i32_1 = arith.constant 0 : i32
    return %c0_i32, %c0_i32_0 : i32, i32
  }
  func.func @transform_5(%arg0: i32) -> (i32, i32) {
    %c0_i32 = arith.constant 0 : i32
    %c0_i32_0 = arith.constant 0 : i32
    %c0_i32_1 = arith.constant 0 : i32
    return %c0_i32, %c0_i32_0 : i32, i32
  }
  func.func @transform_6(%arg0: i32) -> (i32, i32) {
    %c0_i32 = arith.constant 0 : i32
    %c0_i32_0 = arith.constant 0 : i32
    %c0_i32_1 = arith.constant 0 : i32
    return %c0_i32, %c0_i32_0 : i32, i32
  }
  func.func @transform_7(%arg0: i32) -> (i32, i32) {
    %c0_i32 = arith.constant 0 : i32
    %c0_i32_0 = arith.constant 0 : i32
    return %arg0, %c0_i32 : i32, i32
  }
}

</mosaic_0001>

<bundles_post_ra>
// kernel: tpu_custom_call.1
= control target key start
LH: loop header
LB: loop body
LE: loop exit
PB: predicated region body
PF: predicated region fallthrough
CT: control target
= control target key end

     0   :  { %s1501_s0 = inlined_call_operand.hbm [shape: bf16[16,32], index: 0, kind: input, shape index: {}]   ;;  %s1502_s1 = inlined_call_operand.hbm [shape: bf16[16,32], index: 1, kind: input, shape index: {}]   ;;  %s1503_s2 = inlined_call_operand.hbm [shape: bf16[16,32], index: 2, kind: input, shape index: {}]   ;;  %s1504_s3 = inlined_call_operand.hbm [shape: bf16[32,64], index: 3, kind: input, shape index: {}]   ;;  %s1505_s4 = inlined_call_operand.hbm [shape: bf16[32,64], index: 4, kind: input, shape index: {}]   ;;  %s1506_s5 = inlined_call_operand.vmem [shape: bf16[32,64], index: 5, kind: input, shape index: {}]   ;;  %s1507_s6 = inlined_call_operand.vmem [shape: f32[1,64], index: 6, kind: input, shape index: {}]   ;;  %s1508_s7 = inlined_call_operand.hbm [shape: f32[16,32], index: 7, kind: output, shape index: {}]  }
   0x1   :  { %1526 = sst [smem:[#allocation19_spill]] %s1502_s1 }
   0x2   :  { %1527 = sst [smem:[#allocation20_spill]] %s1504_s3 }
   0x3   :  { %12 = vsyncpa [#allocation3], 0 }
   0x4   :  { %14 = vsyncpa [#allocation3 + $0x1], 0 }
   0x5   :  { %15 = vsyncpa [#allocation6], 0 }
   0x6   :  { %17 = vsyncpa [#allocation6 + $0x1], 0 }
   0x7   :  { %18 = vsyncpa [#allocation9], 0 }
   0x8   :  { %19 = vsyncpa [#allocation4], 0 }
   0x9   :  { %21 = vsyncpa [#allocation4 + $0x1], 0  ;;  %s1177_s24 = smov 0   ;;  %s1179_s25 = smov 0  }
   0xa   :  { %s1181_s26 = smov 0   ;;  %s1183_s27 = smov 0  }
   0xb LB: > { %1528 = sst [smem:[#allocation16_spill]] %s1124_s27  ;;  %s1198_s28 = sadd.s32 4294967295, %s1124_s27   ;;  %s1124_s27 = sphi %s1183_s27, %s1558_s27   ;;  %s1120_s26 = sphi %s1181_s26, %s1562_s26   ;;  %s1116_s25 = sphi %s1179_s25, %s1561_s25   ;;  %s1112_s24 = sphi %s1177_s24, %s1560_s24  }
   0xc   : > { %s744_s29 = sadd.s32 4294967294, %s1124_s27   ;;  %p47_p0 = scmp.ne.s32.totalorder %s1116_s25, %s1112_s24 }
   0xd   : > { %p1509_p1 = scmp.eq.s32.totalorder %s1198_s28, 0  ;;  %p213_p3 = scmp.eq.s32.totalorder %s744_s29, 1 }
   0xe   : > { %p745_p5 = scmp.ge.s32.totalorder %s1124_s27, 1  ;;  %p220_p7 = scmp.lt.s32.totalorder %s1124_s27, 3 }
   0xf   : > { %p1207_p4 = por %p1509_p1, %p47_p0  ;;  %p1212_p6 = por %p213_p3, %p47_p0 }
  0x10   : > { %p1217_p8 = pnand %p745_p5, %p220_p7  ;;  %s1126_s10 = smov [#allocation8]  }
  0x11   : > { %s1529_s30 = scalar_select %p1207_p4, 1, 0 }
  0x12   : > { %s1530_s8 = scalar_select %p1212_p6, 1, 0 }
  0x13   : > { %s1531_s9 = scalar_select %p1217_p8, 1, 0 }
  0x14   : > { %s232_s11 = sshll.u32 %s1126_s10, 4  ;;  %p826_p9 = pneg %p1217_p8  ;;  %s1221_s11 = int_to_ptr.vmem [resolvable:$true] %s232_s11 }
  0x15   : > { %s1233_s13 = sadd.s32 1, %s1124_s27   ;;  %s34_s14 = sadd.s32 1, %s1120_s26 }
  0x16   : > { %p1228_p11 = pnand %p826_p9, %p1509_p1  ;;  %1533 = sst [smem:[#allocation17_spill]] %s1233_s13 }
  0x17   : > { %s31_s15 = ssub.s32 %s1124_s27, %s1233_s13  ;;  %s1534_s3 = sld [smem:[#allocation20_spill]] }
  0x18   : > { %s1532_s12 = scalar_select %p1228_p11, 1, 0 }
  0x19   : > { %p1515_p13 = pneg %p1228_p11 }
  0x1d   : > { %s904_s18 = scalar_lea.hbm %s1534_s3, 256 }
  0x1e   : > { %p905_p12 = scmp.ne.s32.totalorder %s1534_s3, %s904_s18  ;;  %p911_p5 = scmp.lt.u32.totalorder %s904_s18, %s1534_s3 }
  0x20   : > { %p907_p0 = pnand %p1515_p13, %p905_p12 }
  0x22   : > { %p908_p3 = pneg %p907_p0 }
  0x24   : > { %p913_p7 = pnand %p911_p5, %p908_p3 }
  0x26   : > { %916 = shalt.err (!%p913_p7)
}
  0x27   : > { %s917_s23 = scalar_lea.vmem %s1221_s11, 256  ;;  %p925_p2 = scmp.lt.s32.totalorder %s1221_s11, %s1221_s11 }
  0x28   : > { %p918_p9 = scmp.ne.s32.totalorder %s1221_s11, %s917_s23  ;;  %p926_p12 = scmp.lt.s32.totalorder %s917_s23, %s917_s23 }
  0x2a   : > { %p920_p10 = pnand %p918_p9, %p1515_p13  ;;  %p927_p0 = por %p926_p12, %p925_p2 }
  0x2c   : > { %p921_p1 = pneg %p920_p10 }
  0x2e   : > { %p928_p6 = pnand %p927_p0, %p921_p1 }
  0x30   : > { %931 = shalt.err (!%p928_p6)
}
  0x31   : > { %s1510_s29 = smov 64   ;;  %s1512_s10 = smov 4  }
  0x32   : > { %829 = dma.hbm_to_vmem [thread:$0]  (!%p1228_p11), %s1534_s3, 256, %s1221_s11, [#allocation9], %s1510_s29, %s1510_s29, %s1512_s10  }
  0x33   : > { %p32_p1 = scmp.eq.s32.totalorder %s31_s15, 0  ;;  %p41_p2 = scmp.ne.s32.totalorder %s1120_s26, %s1116_s25 }
  0x34   : > { %p42_p6 = scmp.eq.s32.totalorder %s1124_s27, 0  ;;  %p849_p10 = scmp.lt.s32.totalorder %s1124_s27, 2 }
  0x35   : > { %s1273_s18 = scalar_select %p32_p1, %s1120_s26, %s34_s14  }
  0x36   : > { %p43_p3 = por %p42_p6, %p41_p2  ;;  %p1536_p5 = scmp.eq.s32.totalorder %s1198_s28, 1 }
  0x37   : > { %1535 = sst [smem:[#allocation18_spill]] %s1273_s18  ;;  %s1511_s20 = sand.u32 1, %s1120_s26  }
  0x38   : > { %p1277_p7 = por %p1536_p5, %p41_p2  ;;  %s1283_s21 = sshll.u32 %s1124_s27, 6 }
  0x39   : > { %s1287_s22 = sshll.u32 %s1511_s20, 2  ;;  %p1289_p9 = pnand %p849_p10, %p43_p3 }
  0x3a   : > { %s1537_s19 = scalar_select %p1277_p7, 1, 0 }
  0x3b   : > { %s1538_s11 = scalar_select %p1289_p9, 1, 0 }
  0x3c   : > { %s283_s14 = sand.u32 1, %s1124_s27   ;;  %s1539_s1 = sld [smem:[#allocation19_spill]] }
  0x3d   : > { %s287_s17 = scalar_lea.vmem [#allocation5], %s1287_s22  ;;  %s1303_s20 = scalar_lea.sflag [#allocation6], %s283_s14 }
  0x3e   : > { %s294_s29 = sshll.u32 %s287_s17, 4  ;;  %p1309_p0 = pneg %p1289_p9  ;;  %s1301_s29 = int_to_ptr.vmem [resolvable:$true] %s294_s29 }
  0x40   : > { %s1540_s3 = scalar_select %p1309_p0, 1, 0 }
  0x42   : > { %s1298_s16 = scalar_lea.hbm %s1539_s1, %s1283_s21  ;;  %s937_s18 = scalar_lea.hbm %s1539_s1, 128 }
  0x43   : > { %s932_s10 = scalar_lea.hbm %s1298_s16, 64  ;;  %p938_p6 = scmp.lt.u32.totalorder %s1298_s16, %s1539_s1 }
  0x44   : > { %p933_p12 = scmp.ne.s32.totalorder %s1298_s16, %s932_s10  ;;  %p939_p10 = scmp.lt.u32.totalorder %s937_s18, %s932_s10 }
  0x45   : > { %p941_p5 = scmp.lt.u32.totalorder %s932_s10, %s1298_s16 }
  0x46   : > { %p935_p1 = pnand %p1309_p0, %p933_p12  ;;  %p940_p3 = por %p939_p10, %p938_p6 }
  0x48   : > { %p936_p2 = pneg %p935_p1  ;;  %p942_p13 = por %p941_p5, %p940_p3 }
  0x4a   : > { %p943_p7 = pnand %p942_p13, %p936_p2 }
  0x4c   : > { %946 = shalt.err (!%p943_p7)
}
  0x4d   : > { %s947_s14 = scalar_lea.vmem %s1301_s29, 64  ;;  %s1129_s15 = smov [#allocation5]  }
  0x4e   : > { %p948_p12 = scmp.ne.s32.totalorder %s1301_s29, %s947_s14  ;;  %s952_s23 = sshll.u32 %s1129_s15, 4  ;;  %s953_s23 = int_to_ptr.vmem [resolvable:$false] %s952_s23 }
  0x4f   : > { %s954_s13 = scalar_lea.vmem %s953_s23, 128  ;;  %p955_p8 = scmp.lt.s32.totalorder %s1301_s29, %s953_s23 }
  0x50   : > { %p950_p1 = pnand %p948_p12, %p1309_p0  ;;  %p956_p11 = scmp.lt.s32.totalorder %s954_s13, %s947_s14 }
  0x52   : > { %p951_p4 = pneg %p950_p1  ;;  %p957_p6 = por %p956_p11, %p955_p8 }
  0x54   : > { %p958_p10 = pnand %p957_p6, %p951_p4 }
  0x56   : > { %961 = shalt.err (!%p958_p10)
}
  0x57   : > { %839 = dma.hbm_to_vmem [thread:$0]  (!%p1289_p9), %s1298_s16, 64, %s1301_s29, %s1303_s20  }
  0x58   : > { %s1130_s10 = smov [#allocation10]   ;;  %s962_s15 = scalar_lea.hbm %s1505_s4, 256 }
  0x59   : > { %s245_s18 = sshll.u32 %s1130_s10, 4  ;;  %p963_p8 = scmp.ne.s32.totalorder %s1505_s4, %s962_s15  ;;  %s246_s18 = int_to_ptr.vmem [resolvable:$true] %s245_s18 }
  0x5a   : > { %p1541_p4 = scmp.ne.s32.totalorder %s1532_s12, 0  ;;  %p969_p2 = scmp.lt.u32.totalorder %s962_s15, %s1505_s4 }
  0x5c   : > { %p1542_p11 = pneg %p1541_p4 }
  0x5e   : > { %p965_p13 = pnand %p963_p8, %p1542_p11 }
  0x60   : > { %p966_p7 = pneg %p965_p13 }
  0x62   : > { %p971_p3 = pnand %p969_p2, %p966_p7 }
  0x64   : > { %974 = shalt.err (!%p971_p3)
}
  0x65   : > { %s975_s29 = scalar_lea.vmem %s246_s18, 256  ;;  %p1543_p12 = pmov %p1542_p11 }
  0x66   : > { %p976_p5 = scmp.ne.s32.totalorder %s246_s18, %s975_s29  ;;  %p983_p10 = scmp.lt.s32.totalorder %s246_s18, %s246_s18 }
  0x67   : > { %p984_p9 = scmp.lt.s32.totalorder %s975_s29, %s975_s29 }
  0x68   : > { %p978_p1 = pnand %p976_p5, %p1543_p12 }
  0x69   : > { %p985_p0 = por %p984_p9, %p983_p10 }
  0x6a   : > { %p979_p6 = pneg %p978_p1 }
  0x6c   : > { %p986_p8 = pnand %p985_p0, %p979_p6 }
  0x6e   : > { %989 = shalt.err (!%p986_p8)
}
  0x6f   : > { %s1544_s1 = smov 4   ;;  %s1545_s27 = smov 64  }
  0x70   : > { %832 = dma.hbm_to_vmem [thread:$0]  (!%p1541_p4), %s1505_s4, 256, %s246_s18, [#allocation9], %s1545_s27, %s1545_s27, %s1544_s1  }
  0x71   : > { %s1360_s23 = scalar_lea.hbm %s1501_s0, %s1283_s21  ;;  %s269_s12 = scalar_lea.vmem [#allocation2], %s1287_s22 }
  0x72   : > { %s276_s14 = sshll.u32 %s269_s12, 4  ;;  %s1546_s13 = sand.u32 1, %s1120_s26   ;;  %s277_s14 = int_to_ptr.vmem [resolvable:$true] %s276_s14 }
  0x73   : > { %s266_s29 = scalar_lea.sflag [#allocation3], %s1546_s13  ;;  %s990_s16 = scalar_lea.hbm %s1360_s23, 64 }
  0x74   : > { %p991_p9 = scmp.ne.s32.totalorder %s1360_s23, %s990_s16  ;;  %p1547_p0 = scmp.ne.s32.totalorder %s1540_s3, 0 }
  0x75   : > { %s995_s27 = scalar_lea.hbm %s1501_s0, 128  ;;  %p996_p4 = scmp.lt.u32.totalorder %s1360_s23, %s1501_s0 }
  0x76   : > { %p993_p11 = pnand %p991_p9, %p1547_p0  ;;  %p997_p7 = scmp.lt.u32.totalorder %s995_s27, %s990_s16 }
  0x77   : > { %p999_p3 = scmp.lt.u32.totalorder %s990_s16, %s1360_s23 }
  0x78   : > { %p994_p13 = pneg %p993_p11  ;;  %p998_p2 = por %p997_p7, %p996_p4 }
  0x7a   : > { %p1000_p5 = por %p999_p3, %p998_p2 }
  0x7c   : > { %p1001_p12 = pnand %p1000_p5, %p994_p13 }
  0x7e   : > { %1004 = shalt.err (!%p1001_p12)
}
  0x7f   : > { %s1005_s15 = scalar_lea.vmem %s277_s14, 64  ;;  %s1131_s12 = smov [#allocation2]  }
  0x80   : > { %p1006_p1 = scmp.ne.s32.totalorder %s277_s14, %s1005_s15  ;;  %s1010_s13 = sshll.u32 %s1131_s12, 4  ;;  %s1011_s13 = int_to_ptr.vmem [resolvable:$false] %s1010_s13 }
  0x81   : > { %s1012_s18 = scalar_lea.vmem %s1011_s13, 128  ;;  %p1013_p8 = scmp.lt.s32.totalorder %s277_s14, %s1011_s13 }
  0x82   : > { %p1008_p6 = pnand %p1006_p1, %p1547_p0  ;;  %p1014_p9 = scmp.lt.s32.totalorder %s1012_s18, %s1005_s15 }
  0x84   : > { %p1009_p10 = pneg %p1008_p6  ;;  %p1015_p11 = por %p1014_p9, %p1013_p8 }
  0x86   : > { %p1016_p4 = pnand %p1015_p11, %p1009_p10 }
  0x88   : > { %1019 = shalt.err (!%p1016_p4)
}
  0x89   : > { %p1548_p7 = scmp.ne.s32.totalorder %s1538_s11, 0  ;;  %s1386_s27 = scalar_lea.hbm %s1503_s2, %s1283_s21 }
  0x8a   : > { %s305_s10 = scalar_lea.vmem [#allocation7], %s1287_s22  ;;  %s1020_s15 = scalar_lea.hbm %s1386_s27, 64 }
  0x8b   : > { %836 = dma.hbm_to_vmem [thread:$0]  (!%p1548_p7), %s1360_s23, 64, %s277_s14, %s266_s29  }
  0x8c   : > { %s312_s17 = sshll.u32 %s305_s10, 4  ;;  %p1021_p13 = scmp.ne.s32.totalorder %s1386_s27, %s1020_s15  ;;  %s313_s17 = int_to_ptr.vmem [resolvable:$true] %s312_s17 }
  0x8d   : > { %s1025_s23 = scalar_lea.hbm %s1503_s2, 128  ;;  %p1026_p5 = scmp.lt.u32.totalorder %s1386_s27, %s1503_s2 }
  0x8e   : > { %p1023_p2 = pnand %p1021_p13, %p1547_p0  ;;  %p1027_p12 = scmp.lt.u32.totalorder %s1025_s23, %s1020_s15 }
  0x8f   : > { %p1029_p6 = scmp.lt.u32.totalorder %s1020_s15, %s1386_s27 }
  0x90   : > { %p1024_p3 = pneg %p1023_p2  ;;  %p1028_p1 = por %p1027_p12, %p1026_p5 }
  0x92   : > { %p1030_p10 = por %p1029_p6, %p1028_p1 }
  0x94   : > { %p1031_p8 = pnand %p1030_p10, %p1024_p3 }
  0x96   : > { %1034 = shalt.err (!%p1031_p8)
}
  0x97   : > { %s1035_s21 = scalar_lea.vmem %s313_s17, 64  ;;  %s1132_s22 = smov [#allocation7]  }
  0x98   : > { %p1036_p9 = scmp.ne.s32.totalorder %s313_s17, %s1035_s21  ;;  %s1040_s18 = sshll.u32 %s1132_s22, 4  ;;  %s1041_s18 = int_to_ptr.vmem [resolvable:$false] %s1040_s18 }
  0x99   : > { %s1042_s16 = scalar_lea.vmem %s1041_s18, 128  ;;  %p1043_p13 = scmp.lt.s32.totalorder %s313_s17, %s1041_s18 }
  0x9a   : > { %p1038_p11 = pnand %p1036_p9, %p1547_p0  ;;  %p1044_p2 = scmp.lt.s32.totalorder %s1042_s16, %s1035_s21 }
  0x9c   : > { %p1039_p4 = pneg %p1038_p11  ;;  %p1045_p7 = por %p1044_p2, %p1043_p13 }
  0x9e   : > { %p1046_p5 = pnand %p1045_p7, %p1039_p4 }
  0xa0   : > { %1049 = shalt.err (!%p1046_p5)
}
  0xa1   : > { %p1549_p12 = scmp.ne.s32.totalorder %s1538_s11, 0  ;;  %p1550_p3 = scmp.ne.s32.totalorder %s1531_s9, 0 }
  0xa2   : > { %s1410_s3 = sand.u32 (!%p1550_p3), 1, %s1116_s25   ;;  %p1551_p0 = scmp.ne.s32.totalorder (!%p1550_p3), %s1529_s30, 0 }
  0xa3   : > { %842 = dma.hbm_to_vmem [thread:$0]  (!%p1549_p12), %s1386_s27, 64, %s313_s17, %s1303_s20  }
  0xa4   : > { %321 = sbr.rel (%p1550_p3) target bundleno = 569 (0x239), region = 48  ;;  %s1413_s1 = sshll.u32 (!%p1550_p3), %s1410_s3, 2 }
  0xa5   : > { %s324_s10 = scalar_lea.sflag (!%p1550_p3), [#allocation3], %s1410_s3  ;;  %s327_s15 = scalar_lea.vmem (!%p1550_p3), [#allocation2], %s1413_s1 }
  0xab   : > { %1095 = dma.done.wait (%p1551_p0), %s324_s10, 64  }
  0xac   : > { %1097 = vsyncadd (%p1551_p0), %s324_s10, 4294967232  ;;  %s332_s9 = sand.u32 1, %s1198_s28   ;;  %s336_s11 = scalar_lea.vmem [#allocation5], %s1413_s1 }
  0xad   : > { %s333_s20 = scalar_lea.sflag [#allocation6], %s332_s9 }
  0xae   : > { %1099 = dma.done.wait (%p1551_p0), %s333_s20, 128  }
  0xaf   : > { %1101 = vsyncadd (%p1551_p0), %s333_s20, 4294967168  ;;  %s345_s27 = scalar_lea.vmem [#allocation7], %s1413_s1  ;;  %p1552_p7 = scmp.eq.s32.totalorder %s1198_s28, 0 }
  0xb1   : > { %1103 = dma.done.wait (%p1552_p7), [#allocation9], 512   ;;  %p1553_p1 = pmov %p1552_p7 }
  0xb2   : > { %v1133_v0 = vmov 0.0   ;;  %vm1134_vm0 = vmmov 0   ;;  %v892_v1 = vld [vmem:[#allocation10] sm:$0xff]   ;;  %v893_v2 = vld [vmem:[#allocation8] sm:$0xff]   ;;  %v894_v3 = vld [vmem:[#allocation10 + $0x8] sm:$0xff]   ;;  %vm417_vm1 = vcmask 261120  }
  0xb3   : > { %1105 = vsyncadd (%p1553_p1), [#allocation9], 4294966784  ;;  %786 = vmatprep.subr.bf16.mxu0 %v1133_v0  ;;  %794 = vmatprep.subr.bf16.mxu1 %v1133_v0  ;;  %v895_v4 = vld [vmem:[#allocation8 + $0x8] sm:$0xff]   ;;  %v400_v5 = vld [vmem:[%s336_s11] sm:$0xf]  ;;  %s1135_s29 = smov 96  }
  0xb4   : > { %790 = vmatprep.mubr.msk.bf16.mxu0 %vm1134_vm0, %v1133_v0  ;;  %798 = vmatprep.mubr.msk.bf16.mxu1 %vm1134_vm0, %v1133_v0  ;;  %v896_v6 = vld [vmem:[%s1506_s5] sm:$0xff]   ;;  %v395_v7 = vld [vmem:[%s327_s15] sm:$0xf]  ;;  %v897_v8 = vld [vmem:[%s1506_s5 + $0x8] sm:$0xff]   ;;  %s761_s21 = sshll.u32 %s1410_s3, 3  ;;  %s774_s22 = sshll.u32 %s1198_s28, 7 }
  0xb5   : > { %787 = vmatpush3.bf16.msra.mxu0 %v892_v1  ;;  %795 = vmatpush3.bf16.msra.mxu1 %v893_v2  ;;  %v516_v9 = vld [vmem:[%s345_s27] sm:$0xf]  ;;  %s393_s18 = scalar_lea.vmem [#allocation11], %s761_s21  ;;  %s1456_s15 = scalar_lea.hbm %s1508_s7, %s774_s22 }
  0xb6   : > { %788 = vmatprep.subr.bf16.mxu0 %v1133_v0  ;;  %796 = vmatprep.subr.bf16.mxu1 %v1133_v0  ;;  %v771_v20 = vld [vmem:[%s1507_s6] ss:$0 sm:$0xff]  ;;  %s612_s16 = sshll.u32 %s393_s18, 4  ;;  %s599_s9 = scalar_lea.sflag [#allocation4], %s1410_s3  ;;  %s1458_s16 = int_to_ptr.vmem [resolvable:$true] %s612_s16 }
  0xb7   : > { %s1050_s20 = scalar_lea.vmem %s1458_s16, 128  ;;  %p1554_p10 = scmp.ne.s32.totalorder %s1537_s19, 0 }
  0xb8   : > { %p1051_p6 = scmp.ne.s32.totalorder %s1458_s16, %s1050_s20  ;;  %s1136_s28 = smov [#allocation11]  }
  0xb9   : > { %789 = vmatpush3.bf16.msra.mxu0 %v894_v3  ;;  %797 = vmatpush3.bf16.msra.mxu1 %v895_v4  ;;  %s1054_s11 = sshll.u32 %s1136_s28, 4  ;;  %s1055_s11 = int_to_ptr.vmem [resolvable:$false] %s1054_s11 }
  0xba   : > { %802 = vmatprep.subr.bf16.mxu0 %v1133_v0  ;;  %p1052_p8 = pnand %p1051_p6, %p1554_p10  ;;  %s1056_s27 = scalar_lea.vmem %s1055_s11, 256 }
  0xbb   : > { %p1057_p11 = scmp.lt.s32.totalorder %s1458_s16, %s1055_s11  ;;  %p1058_p4 = scmp.lt.s32.totalorder %s1056_s27, %s1050_s20 }
  0xbc   : > { %791 = vmatmul.mubr.msk.bf16.vlgmr.msra.gmra.mrb[0].mxu0 %vm417_vm1, %v400_v5  ;;  %799 = vmatmul.mubr.msk.bf16.vlgmr.msra.gmra.mrb[0].mxu1 %vm417_vm1, %v395_v7  ;;  %p1053_p9 = pneg %p1052_p8 }
  0xbd   : > { %803 = vmatpush3.bf16.msra.mxu0 %v896_v6  ;;  %806 = vmatprep.mubr.msk.bf16.mxu0 %vm1134_vm0, %v1133_v0  ;;  %p1059_p13 = por %p1058_p4, %p1057_p11 }
  0xbe   : > { %804 = vmatprep.subr.bf16.mxu0 %v1133_v0 }
  0xbf   : > { %p1060_p2 = pnand %p1059_p13, %p1053_p9 }
  0xc1   : > { %805 = vmatpush3.bf16.msra.mxu0 %v897_v8 }
  0xc4   : > { %807 = vmatmul.mubr.msk.bf16.vlgmr.msra.gmra.mrb[4].mxu0 %vm417_vm1, %v516_v9 }
 0x18f   : > { %v455_v10 = vpop.f32.mrb[0].mxu0  ;;  %v510_v12 = vpop.f32.mrb[0].mxu1 }
 0x190   : > { %v792_v11 = vpop.f32.mrb[1].mxu0  ;;  %v511_v13 = vadd.f32 %v510_v12, %v455_v10  ;;  %v800_v15 = vpop.f32.mrb[1].mxu1 }
 0x191   : > { %v458_v14 = vpop.f32.mrb[2].mxu0  ;;  %v513_v17 = vpop.f32.mrb[2].mxu1 }
 0x192   : > { %v793_v16 = vpop.f32.mrb[3].mxu0  ;;  %v801_v18 = vpop.f32.mrb[3].mxu1 }
 0x197   : > { %v570_v19 = vpop.f32.mrb[4].mxu0 }
 0x198   : > { %v576_v21 = vadd.f32 %v570_v19, %v511_v13  ;;  %v808_v22 = vpop.f32.mrb[5].mxu0 }
 0x199   : > { %v573_v23 = vpop.f32.mrb[6].mxu0 }
 0x19a   : > { %v584_v24 = vadd.f32 %v771_v20, %v576_v21  ;;  %v809_v25 = vpop.f32.mrb[7].mxu0 }
 0x19c   : > { %v772_v26 = vmul.f32 -1.442695, %v584_v24 }
 0x19e   : > { %898 = vpow2.f32 %v772_v26 }
 0x1a8   : > { %v899_v27 = vpop.eup %898 }
 0x1a9   : > { %v589_v28 = vadd.f32 1.0, %v899_v27 }
 0x1ab   : > { %900 = vrcp.f32 %v589_v28 }
 0x1ac   : > { %902 = vtanh.f32 %v584_v24 }
 0x1b5   : > { %v901_v29 = vpop.eup %900 }
 0x1b6   : > { %593 = vrot.lane.b32.xlu0 %v901_v29, %s1135_s29  ;;  %v903_v30 = vpop.eup %902 }
 0x228   : > { %v594_v31 = vpop.permute.xlu0 %593 }
 0x229   : > { %v596_v32 = vmul.f32 %v903_v30, %v594_v31 }
 0x22b   : > { %597 = vst.msk [vmem:[%s393_s18] sm:$0xff] %vm417_vm1, %v596_v32 }
 0x22c   : > { %1063 = shalt.err (!%p1060_p2)
}
 0x22d   : > { %s1064_s3 = scalar_lea.hbm %s1456_s15, 128  ;;  %s1068_s12 = scalar_lea.hbm %s1508_s7, 256 }
 0x22e   : > { %p1065_p5 = scmp.ne.s32.totalorder %s1456_s15, %s1064_s3  ;;  %p1069_p0 = scmp.lt.u32.totalorder %s1456_s15, %s1508_s7 }
 0x22f   : > { %p1070_p7 = scmp.lt.u32.totalorder %s1068_s12, %s1064_s3  ;;  %p1072_p6 = scmp.lt.u32.totalorder %s1064_s3, %s1456_s15 }
 0x230   : > { %p1066_p12 = pnand %p1065_p5, %p1554_p10 }
 0x231   : > { %p1071_p1 = por %p1070_p7, %p1069_p0 }
 0x232   : > { %p1067_p3 = pneg %p1066_p12 }
 0x233   : > { %p1073_p8 = por %p1072_p6, %p1071_p1 }
 0x235   : > { %p1074_p9 = pnand %p1073_p8, %p1067_p3 }
 0x237   : > { %1077 = shalt.err (!%p1074_p9)
}
 0x238   : > { %824 = dma.vmem_to_hbm [thread:$0]  (%p1554_p10), %s1458_s16, 128, %s1456_s15, %s599_s9  }
 0x239 PF: > { %s1555_s14 = sld [smem:[#allocation16_spill]]  ;;  %s624_s29 = sand.u32 1, %s1112_s24  }
 0x23a   : > { %p1556_p11 = scmp.ne.s32.totalorder %s1530_s8, 0  ;;  %s625_s21 = scalar_lea.sflag [#allocation4], %s624_s29 }
 0x23f   : > { %p1557_p4 = scmp.ge.s32.totalorder %s1555_s14, 2 }
 0x241   : > { %p844_p13 = pnand %p1557_p4, %p1556_p11 }
 0x243   : > { %1107 = dma.done.wait (!%p844_p13), %s625_s21, 128  }
 0x244   : > { %1109 = vsyncadd (!%p844_p13), %s625_s21, 4294967168  ;;  %s1558_s27 = sld [smem:[#allocation17_spill]]  ;;  %s1559_s22 = sld [smem:[#allocation18_spill]] }
 0x245   : > { %s1560_s24 = smov %s1116_s25  ;;  %s1561_s25 = smov %s1120_s26 }
 0x24a   : > { %p24_p2 = scmp.ge.s32.totalorder %s1558_s27, 4   ;;  %s1562_s26 = smov %s1559_s22 }
 0x24c   :  { %26 = sbr.rel (!%p24_p2) target bundleno = 11 (0xb), region = 125 }
 0x253   :  { %630 = vsyncpa [#allocation3], 1 }
 0x254   :  { %632 = vsyncpa [#allocation3 + $0x1], 1 }
 0x255   :  { %633 = vsyncpa [#allocation6], 1 }
 0x256   :  { %635 = vsyncpa [#allocation6 + $0x1], 1 }
 0x257   :  { %636 = vsyncpa [#allocation9], 1 }
 0x258   :  { %637 = vsyncpa [#allocation4], 1 }
 0x259   :  { %639 = vsyncpa [#allocation4 + $0x1], 1 }

</bundles_post_ra>
